<compile_context>
chip_gen: v7x
topology: tpu7x:2x2x1
jax: 0.10.0
libtpu: 0.0.40
codegen_flags: <defaults>
</compile_context>

<pallas_src>
import functools

import jax
import jax.numpy as jnp
from jax.experimental import pallas as pl
from jax.experimental.pallas import tpu as pltpu

_MAX_INFLIGHT = 8  # cap on concurrent DMAs / DMA semaphores, independent of W


def _shard_groups(W, S, max_inflight):
    """Statically group the W shards into <= max_inflight contiguous row chunks.

    Chunk boundaries stay on shard boundaries (multiples of S rows), so each
    DMA copies whole shards.  Returns a tuple of (row_start, row_count).
    """
    n = min(max_inflight, W)
    base, rem = divmod(W, n)
    groups = []
    shard_start = 0
    for i in range(n):
        shards = base + (1 if i < rem else 0)
        groups.append((shard_start * S, shards * S))
        shard_start += shards
    return tuple(groups)


def _make_allgather_kernel(chunks):
    """Kernel factory; `chunks` is a static tuple of (row_start, row_count)."""

    def kernel(out_in_hbm, x_flat_hbm, out_hbm, sem):
        # out_in_hbm: aliased pre-allocated output buffer (same HBM as out_hbm
        #             via input_output_aliases); fully overwritten, never read.
        # x_flat_hbm: [W*S, H] flattened shards, raw HBM ref.
        # out_hbm:    [W*S, H] gathered output, raw HBM ref.
        # sem:        one DMA semaphore per chunk (bounded by _MAX_INFLIGHT).
        del out_in_hbm

        # Build each descriptor once; reuse it for start() and wait().
        copies = [
            pltpu.make_async_copy(
                x_flat_hbm.at[pl.ds(start, size), :],
                out_hbm.at[pl.ds(start, size), :],
                sem.at[i],
            )
            for i, (start, size) in enumerate(chunks)
        ]
        # Start every chunk's HBM->HBM DMA first (keeps several copies in
        # flight to saturate HBM BW and hide descriptor latency), then wait.
        for c in copies:
            c.start()
        for c in copies:
            c.wait()

    return kernel


def _allgather_into_tensor_impl(out_tensor, x_shards):
    """Emulates torch.distributed.all_gather_into_tensor.

    out_tensor: [W*S, H] pre-allocated buffer (aliased, fully overwritten)
    x_shards:   [W, S, H] -- shard r is the `x` held by rank r
    returns:    [W*S, H] == concat over ranks of x along dim 0
    """
    W, S, H = x_shards.shape
    assert out_tensor.shape == (W * S, H)
    assert out_tensor.dtype == x_shards.dtype
    total_rows = W * S
    dtype_bytes = jnp.dtype(x_shards.dtype).itemsize

    # Metadata-only under jit: source bytes are already in gathered order.
    x_flat = x_shards.reshape(total_rows, H)
    chunks = _shard_groups(W, S, _MAX_INFLIGHT)

    return pl.pallas_call(
        _make_allgather_kernel(chunks),
        out_shape=jax.ShapeDtypeStruct((total_rows, H), x_shards.dtype),
        in_specs=[
            pl.BlockSpec(memory_space=pl.ANY),  # aliased out_tensor (unread)
            pl.BlockSpec(memory_space=pl.ANY),  # x_flat, raw HBM ref
        ],
        out_specs=pl.BlockSpec(memory_space=pl.ANY),  # written via DMA only
        scratch_shapes=[pltpu.SemaphoreType.DMA((len(chunks),))],
        input_output_aliases={0: 0},  # out_tensor is written in place
        # Pure memory op: read W*S*H + write W*S*H elements, zero flops.
        cost_estimate=pl.CostEstimate(
            flops=0,
            transcendentals=0,
            bytes_accessed=2 * total_rows * H * dtype_bytes,
        ),
    )(out_tensor, x_flat)


# Donate out_tensor so the input/output alias is real (no hidden defensive
# copy of the pre-allocated buffer before the kernel runs).
allgather_into_tensor = jax.jit(_allgather_into_tensor_impl, donate_argnums=(0,))


if __name__ == "__main__":
    # simulated world_size, per-rank seq, hidden (lane-dense: H multiple of 128)
    W, S, H = 4, 8, 128

    key = jax.random.PRNGKey(0)
    x_shards = jax.random.normal(key, (W, S, H), dtype=jnp.float32)
    out_tensor = jnp.zeros((W * S, H), dtype=jnp.float32)

    # Reference (computed before out_tensor is donated/consumed).
    expected = jax.block_until_ready(jnp.reshape(x_shards, (W * S, H)))

    gathered = allgather_into_tensor(out_tensor, x_shards)
    gathered = jax.block_until_ready(gathered)

    assert gathered.shape == (W * S, H)
    assert gathered.dtype == expected.dtype
    assert jnp.array_equal(gathered, expected), "all_gather mismatch"

    print("KERNEL_OK")
</pallas_src>

<mosaic_0001>
module attributes {stable_mosaic.version = 11 : i64} {
  func.func @kernel(%arg0: memref<32x128xf32, #tpu.memory_space<any>>, %arg1: memref<32x128xf32, #tpu.memory_space<any>>, %arg2: memref<32x128xf32, #tpu.memory_space<any>>, %arg3: memref<4x!tpu.dma_semaphore, #tpu.memory_space<semaphore_mem>>) attributes {dimension_semantics = [], scalar_prefetch = 0 : i64, scratch_operands = 1 : i64, tpu.core_type = #tpu.core_type<tc>} {
    %c0_i32 = arith.constant 0 : i32
    %c0_i32_0 = arith.constant 0 : i32
    %c0_i32_1 = arith.constant 0 : i32
    %0 = tpu.memref_slice %arg1[%c0_i32_0, %c0_i32_1] : memref<32x128xf32, #tpu.memory_space<any>> -> memref<8x128xf32, #tpu.memory_space<any>>
    %c0_i32_2 = arith.constant 0 : i32
    %c0_i32_3 = arith.constant 0 : i32
    %1 = tpu.memref_slice %arg2[%c0_i32_2, %c0_i32_3] : memref<32x128xf32, #tpu.memory_space<any>> -> memref<8x128xf32, #tpu.memory_space<any>>
    %2 = tpu.memref_slice %arg3[%c0_i32] : memref<4x!tpu.dma_semaphore, #tpu.memory_space<semaphore_mem>> -> memref<1x!tpu.dma_semaphore, #tpu.memory_space<semaphore_mem>>
    %3 = tpu.memref_squeeze %2 : memref<1x!tpu.dma_semaphore, #tpu.memory_space<semaphore_mem>> -> memref<!tpu.dma_semaphore, #tpu.memory_space<semaphore_mem>>
    tpu.enqueue_dma source(%0 : memref<8x128xf32, #tpu.memory_space<any>>) target(%1 : memref<8x128xf32, #tpu.memory_space<any>>) target_semaphore(%3 : memref<!tpu.dma_semaphore, #tpu.memory_space<semaphore_mem>>)
    %c1_i32 = arith.constant 1 : i32
    %c8_i32 = arith.constant 8 : i32
    %c0_i32_4 = arith.constant 0 : i32
    %4 = tpu.memref_slice %arg1[%c8_i32, %c0_i32_4] : memref<32x128xf32, #tpu.memory_space<any>> -> memref<8x128xf32, #tpu.memory_space<any>>
    %c8_i32_5 = arith.constant 8 : i32
    %c0_i32_6 = arith.constant 0 : i32
    %5 = tpu.memref_slice %arg2[%c8_i32_5, %c0_i32_6] : memref<32x128xf32, #tpu.memory_space<any>> -> memref<8x128xf32, #tpu.memory_space<any>>
    %6 = tpu.memref_slice %arg3[%c1_i32] : memref<4x!tpu.dma_semaphore, #tpu.memory_space<semaphore_mem>> -> memref<1x!tpu.dma_semaphore, #tpu.memory_space<semaphore_mem>>
    %7 = tpu.memref_squeeze %6 : memref<1x!tpu.dma_semaphore, #tpu.memory_space<semaphore_mem>> -> memref<!tpu.dma_semaphore, #tpu.memory_space<semaphore_mem>>
    tpu.enqueue_dma source(%4 : memref<8x128xf32, #tpu.memory_space<any>>) target(%5 : memref<8x128xf32, #tpu.memory_space<any>>) target_semaphore(%7 : memref<!tpu.dma_semaphore, #tpu.memory_space<semaphore_mem>>)
    %c2_i32 = arith.constant 2 : i32
    %c16_i32 = arith.constant 16 : i32
    %c0_i32_7 = arith.constant 0 : i32
    %8 = tpu.memref_slice %arg1[%c16_i32, %c0_i32_7] : memref<32x128xf32, #tpu.memory_space<any>> -> memref<8x128xf32, #tpu.memory_space<any>>
    %c16_i32_8 = arith.constant 16 : i32
    %c0_i32_9 = arith.constant 0 : i32
    %9 = tpu.memref_slice %arg2[%c16_i32_8, %c0_i32_9] : memref<32x128xf32, #tpu.memory_space<any>> -> memref<8x128xf32, #tpu.memory_space<any>>
    %10 = tpu.memref_slice %arg3[%c2_i32] : memref<4x!tpu.dma_semaphore, #tpu.memory_space<semaphore_mem>> -> memref<1x!tpu.dma_semaphore, #tpu.memory_space<semaphore_mem>>
    %11 = tpu.memref_squeeze %10 : memref<1x!tpu.dma_semaphore, #tpu.memory_space<semaphore_mem>> -> memref<!tpu.dma_semaphore, #tpu.memory_space<semaphore_mem>>
    tpu.enqueue_dma source(%8 : memref<8x128xf32, #tpu.memory_space<any>>) target(%9 : memref<8x128xf32, #tpu.memory_space<any>>) target_semaphore(%11 : memref<!tpu.dma_semaphore, #tpu.memory_space<semaphore_mem>>)
    %c3_i32 = arith.constant 3 : i32
    %c24_i32 = arith.constant 24 : i32
    %c0_i32_10 = arith.constant 0 : i32
    %12 = tpu.memref_slice %arg1[%c24_i32, %c0_i32_10] : memref<32x128xf32, #tpu.memory_space<any>> -> memref<8x128xf32, #tpu.memory_space<any>>
    %c24_i32_11 = arith.constant 24 : i32
    %c0_i32_12 = arith.constant 0 : i32
    %13 = tpu.memref_slice %arg2[%c24_i32_11, %c0_i32_12] : memref<32x128xf32, #tpu.memory_space<any>> -> memref<8x128xf32, #tpu.memory_space<any>>
    %14 = tpu.memref_slice %arg3[%c3_i32] : memref<4x!tpu.dma_semaphore, #tpu.memory_space<semaphore_mem>> -> memref<1x!tpu.dma_semaphore, #tpu.memory_space<semaphore_mem>>
    %15 = tpu.memref_squeeze %14 : memref<1x!tpu.dma_semaphore, #tpu.memory_space<semaphore_mem>> -> memref<!tpu.dma_semaphore, #tpu.memory_space<semaphore_mem>>
    tpu.enqueue_dma source(%12 : memref<8x128xf32, #tpu.memory_space<any>>) target(%13 : memref<8x128xf32, #tpu.memory_space<any>>) target_semaphore(%15 : memref<!tpu.dma_semaphore, #tpu.memory_space<semaphore_mem>>)
    %c0_i32_13 = arith.constant 0 : i32
    %c0_i32_14 = arith.constant 0 : i32
    %c0_i32_15 = arith.constant 0 : i32
    %16 = tpu.memref_slice %arg1[%c0_i32_14, %c0_i32_15] : memref<32x128xf32, #tpu.memory_space<any>> -> memref<8x128xf32, #tpu.memory_space<any>>
    %c0_i32_16 = arith.constant 0 : i32
    %c0_i32_17 = arith.constant 0 : i32
    %17 = tpu.memref_slice %arg2[%c0_i32_16, %c0_i32_17] : memref<32x128xf32, #tpu.memory_space<any>> -> memref<8x128xf32, #tpu.memory_space<any>>
    %18 = tpu.memref_slice %arg3[%c0_i32_13] : memref<4x!tpu.dma_semaphore, #tpu.memory_space<semaphore_mem>> -> memref<1x!tpu.dma_semaphore, #tpu.memory_space<semaphore_mem>>
    %19 = tpu.memref_squeeze %18 : memref<1x!tpu.dma_semaphore, #tpu.memory_space<semaphore_mem>> -> memref<!tpu.dma_semaphore, #tpu.memory_space<semaphore_mem>>
    tpu.wait_dma2 semaphore(%19 : memref<!tpu.dma_semaphore, #tpu.memory_space<semaphore_mem>>) src(%16 : memref<8x128xf32, #tpu.memory_space<any>>) dst(%17 : memref<8x128xf32, #tpu.memory_space<any>>)
    %c1_i32_18 = arith.constant 1 : i32
    %c8_i32_19 = arith.constant 8 : i32
    %c0_i32_20 = arith.constant 0 : i32
    %20 = tpu.memref_slice %arg1[%c8_i32_19, %c0_i32_20] : memref<32x128xf32, #tpu.memory_space<any>> -> memref<8x128xf32, #tpu.memory_space<any>>
    %c8_i32_21 = arith.constant 8 : i32
    %c0_i32_22 = arith.constant 0 : i32
    %21 = tpu.memref_slice %arg2[%c8_i32_21, %c0_i32_22] : memref<32x128xf32, #tpu.memory_space<any>> -> memref<8x128xf32, #tpu.memory_space<any>>
    %22 = tpu.memref_slice %arg3[%c1_i32_18] : memref<4x!tpu.dma_semaphore, #tpu.memory_space<semaphore_mem>> -> memref<1x!tpu.dma_semaphore, #tpu.memory_space<semaphore_mem>>
    %23 = tpu.memref_squeeze %22 : memref<1x!tpu.dma_semaphore, #tpu.memory_space<semaphore_mem>> -> memref<!tpu.dma_semaphore, #tpu.memory_space<semaphore_mem>>
    tpu.wait_dma2 semaphore(%23 : memref<!tpu.dma_semaphore, #tpu.memory_space<semaphore_mem>>) src(%20 : memref<8x128xf32, #tpu.memory_space<any>>) dst(%21 : memref<8x128xf32, #tpu.memory_space<any>>)
    %c2_i32_23 = arith.constant 2 : i32
    %c16_i32_24 = arith.constant 16 : i32
    %c0_i32_25 = arith.constant 0 : i32
    %24 = tpu.memref_slice %arg1[%c16_i32_24, %c0_i32_25] : memref<32x128xf32, #tpu.memory_space<any>> -> memref<8x128xf32, #tpu.memory_space<any>>
    %c16_i32_26 = arith.constant 16 : i32
    %c0_i32_27 = arith.constant 0 : i32
    %25 = tpu.memref_slice %arg2[%c16_i32_26, %c0_i32_27] : memref<32x128xf32, #tpu.memory_space<any>> -> memref<8x128xf32, #tpu.memory_space<any>>
    %26 = tpu.memref_slice %arg3[%c2_i32_23] : memref<4x!tpu.dma_semaphore, #tpu.memory_space<semaphore_mem>> -> memref<1x!tpu.dma_semaphore, #tpu.memory_space<semaphore_mem>>
    %27 = tpu.memref_squeeze %26 : memref<1x!tpu.dma_semaphore, #tpu.memory_space<semaphore_mem>> -> memref<!tpu.dma_semaphore, #tpu.memory_space<semaphore_mem>>
    tpu.wait_dma2 semaphore(%27 : memref<!tpu.dma_semaphore, #tpu.memory_space<semaphore_mem>>) src(%24 : memref<8x128xf32, #tpu.memory_space<any>>) dst(%25 : memref<8x128xf32, #tpu.memory_space<any>>)
    %c3_i32_28 = arith.constant 3 : i32
    %c24_i32_29 = arith.constant 24 : i32
    %c0_i32_30 = arith.constant 0 : i32
    %28 = tpu.memref_slice %arg1[%c24_i32_29, %c0_i32_30] : memref<32x128xf32, #tpu.memory_space<any>> -> memref<8x128xf32, #tpu.memory_space<any>>
    %c24_i32_31 = arith.constant 24 : i32
    %c0_i32_32 = arith.constant 0 : i32
    %29 = tpu.memref_slice %arg2[%c24_i32_31, %c0_i32_32] : memref<32x128xf32, #tpu.memory_space<any>> -> memref<8x128xf32, #tpu.memory_space<any>>
    %30 = tpu.memref_slice %arg3[%c3_i32_28] : memref<4x!tpu.dma_semaphore, #tpu.memory_space<semaphore_mem>> -> memref<1x!tpu.dma_semaphore, #tpu.memory_space<semaphore_mem>>
    %31 = tpu.memref_squeeze %30 : memref<1x!tpu.dma_semaphore, #tpu.memory_space<semaphore_mem>> -> memref<!tpu.dma_semaphore, #tpu.memory_space<semaphore_mem>>
    tpu.wait_dma2 semaphore(%31 : memref<!tpu.dma_semaphore, #tpu.memory_space<semaphore_mem>>) src(%28 : memref<8x128xf32, #tpu.memory_space<any>>) dst(%29 : memref<8x128xf32, #tpu.memory_space<any>>)
    return
  }
}

</mosaic_0001>

<bundles_post_ra>
// kernel: _allgather_into_tensor_impl.1
= control target key start
LH: loop header
LB: loop body
LE: loop exit
PB: predicated region body
PF: predicated region fallthrough
CT: control target
= control target key end

     0   :  { %s125_s12 = smov [#allocation2]   ;;  %s126_s13 = smov [#allocation3]   ;;  %s173_s0 = inlined_call_operand.hbm [shape: f32[32,128], index: 0, kind: input, shape index: {}, may-alias: {0,2}]   ;;  %s174_s1 = inlined_call_operand.hbm [shape: f32[32,128], index: 1, kind: input, shape index: {}]   ;;  %s175_s2 = inlined_call_operand.hbm [shape: f32[32,128], index: 2, kind: output, shape index: {}, may-alias: {0,2}]  }
   0x1   :  { %s20_s11 = scalar_lea.hbm %s174_s1, 128  ;;  %s127_s14 = smov 0  }
   0x2   :  { %19 = dma.general %s174_s1, 128, %s175_s2, %s125_s12, %s126_s13, [#allocation4], %s127_s14, 0  }
   0x3   :  { %s21_s20 = scalar_lea.hbm %s175_s2, 128  ;;  %s36_s23 = scalar_lea.hbm %s174_s1, 256 }
   0x4   :  { %s128_s24 = smov [#allocation2 + $0x1]   ;;  %s129_s25 = smov [#allocation5]  }
   0x5   :  { %35 = dma.general %s20_s11, 128, %s21_s20, %s128_s24, %s129_s25, [#allocation6], %s127_s14, 0  }
   0x6   :  { %s37_s28 = scalar_lea.hbm %s175_s2, 256  ;;  %s52_s3 = scalar_lea.hbm %s174_s1, 384 }
   0x7   :  { %s130_s4 = smov [#allocation2 + $0x2]   ;;  %s131_s5 = smov [#allocation7]  }
   0x8   :  { %51 = dma.general %s36_s23, 128, %s37_s28, %s130_s4, %s131_s5, [#allocation8], %s127_s14, 0  }
   0x9   :  { %s53_s8 = scalar_lea.hbm %s175_s2, 384  ;;  %s132_s9 = smov [#allocation2 + $0x3]  }
   0xa   :  { %s133_s10 = smov [#allocation9]  }
   0xb   :  { %67 = dma.general %s52_s3, 128, %s53_s8, %s132_s9, %s133_s10, [#allocation10], %s127_s14, 0  }
   0xc   :  { %117 = dma.done.wait [#allocation2], 128 }
   0xd   :  { %118 = vsyncadd [#allocation2], 4294967168 }
   0xe   :  { %119 = dma.done.wait [#allocation2 + $0x1], 128 }
   0xf   :  { %120 = vsyncadd [#allocation2 + $0x1], 4294967168 }
  0x10   :  { %121 = dma.done.wait [#allocation2 + $0x2], 128 }
  0x11   :  { %122 = vsyncadd [#allocation2 + $0x2], 4294967168 }
  0x12   :  { %123 = dma.done.wait [#allocation2 + $0x3], 128 }
  0x13   :  { %124 = vsyncadd [#allocation2 + $0x3], 4294967168 }
  0x14   :  { %77 = vsyncmov [#allocation2] }
  0x17   :  { %s78_s1 = vpop.sfrf %77 }
  0x18   :  { %p104_p0 = scmp.ne.s32.totalorder %s78_s1, 0 }
  0x1a   :  { %82 = shalt.err (%p104_p0)  }
  0x1b   :  { %84 = vsyncmov [#allocation2 + $0x1] }
  0x1e   :  { %s85_s11 = vpop.sfrf %84 }
  0x1f   :  { %p105_p1 = scmp.ne.s32.totalorder %s85_s11, 0 }
  0x21   :  { %89 = shalt.err (%p105_p1)  }
  0x22   :  { %91 = vsyncmov [#allocation2 + $0x2] }
  0x25   :  { %s92_s2 = vpop.sfrf %91 }
  0x26   :  { %p106_p2 = scmp.ne.s32.totalorder %s92_s2, 0 }
  0x28   :  { %96 = shalt.err (%p106_p2)  }
  0x29   :  { %98 = vsyncmov [#allocation2 + $0x3] }
  0x2c   :  { %s99_s12 = vpop.sfrf %98 }
  0x2d   :  { %p107_p3 = scmp.ne.s32.totalorder %s99_s12, 0 }
  0x2f   :  { %103 = shalt.err (%p107_p3)  }

</bundles_post_ra>
